<compile_context>
chip_gen: v7x
topology: tpu7x:2x2x1
jax: 0.10.0
libtpu: 0.0.40
codegen_flags: <defaults>
</compile_context>

<pallas_src>
import functools

import jax
import jax.numpy as jnp
from jax.experimental import pallas as pl
from jax.experimental.pallas import tpu as pltpu

HIDDEN = 256


def _round_up(x, m):
    return (x + m - 1) // m * m


def _cdiv(a, b):
    return (a + b - 1) // b


# --------------------------------------------------------------------------- #
# Kernel
# --------------------------------------------------------------------------- #
def _actor_kernel(s_ref, w1_ref, b1_ref, w2_ref, b2_ref, w3_ref, b3_ref,
                  out_ref, *, max_action):
    x = s_ref[...]                                                    # (TB, S_pad) bf16
    # layer 1: (TB, S_pad) @ (S_pad, 256)  [bf16 MXU, f32 acc] + bias -> relu
    h1 = jnp.dot(x, w1_ref[...], preferred_element_type=jnp.float32) + b1_ref[...]
    h1 = jnp.maximum(h1, 0.0).astype(jnp.bfloat16)
    # layer 2: (TB, 256) @ (256, 256) + bias -> relu
    h2 = jnp.dot(h1, w2_ref[...], preferred_element_type=jnp.float32) + b2_ref[...]
    h2 = jnp.maximum(h2, 0.0).astype(jnp.bfloat16)
    # layer 3: (TB, 256) @ (256, A_pad) + bias -> max_action * tanh (f32 epilogue)
    h3 = jnp.dot(h2, w3_ref[...], preferred_element_type=jnp.float32) + b3_ref[...]
    out_ref[...] = (max_action * jnp.tanh(h3)).astype(out_ref.dtype)


# --------------------------------------------------------------------------- #
# One-time parameter preparation (hoisted out of the forward call)
# --------------------------------------------------------------------------- #
def prepare_actor_params(params):
    """Zero-pad + cast parameters once (call at init / after every param update).

    Returns (w1p, b1, w2, b2, w3p, b3p) with:
      w1p: (S_pad, 256) bf16   (S padded up to multiple of 16, extra rows = 0)
      w2 : (256, 256)   bf16
      w3p: (256, A_pad) bf16   (A padded up to multiple of 8,  extra cols = 0)
      b* : (1, N)       f32
    """
    w1, b1, w2, b2, w3, b3 = params

    def as_row(b):
        b = jnp.asarray(b, jnp.float32)
        return b[None, :] if b.ndim == 1 else b

    b1, b2, b3 = as_row(b1), as_row(b2), as_row(b3)

    s_dim, hidden = w1.shape
    a_dim = w3.shape[1]
    s_pad = _round_up(s_dim, 16)
    a_pad = _round_up(a_dim, 8)

    w1p = jnp.zeros((s_pad, hidden), jnp.bfloat16).at[:s_dim, :].set(
        w1.astype(jnp.bfloat16))
    w2p = w2.astype(jnp.bfloat16)
    w3p = jnp.zeros((hidden, a_pad), jnp.bfloat16).at[:, :a_dim].set(
        w3.astype(jnp.bfloat16))
    b3p = jnp.zeros((1, a_pad), jnp.float32).at[:, :a_dim].set(b3)

    return (w1p, b1, w2p, b2, w3p, b3p)


# --------------------------------------------------------------------------- #
# Forward wrapper
# --------------------------------------------------------------------------- #
def _choose_batch_tiling(B, tile_b):
    """Pick (num_steps, tile_rows) with tile_rows a multiple of 16 and
    num_steps even (>= 2) whenever the padded batch is >= 32 so both v7x
    TensorCores get work."""
    b16 = _round_up(B, 16)
    if b16 < 32:
        return 1, b16
    n = max(2, 2 * _cdiv(b16, 2 * tile_b))
    tb = _round_up(_cdiv(b16, n), 16)
    return n, tb


@functools.partial(jax.jit, static_argnames=("max_action", "action_dim", "tile_b"))
def actor_forward(state, prepared_params, *, max_action, action_dim, tile_b=1024):
    """Fused Actor forward.  state: (B, state_dim) f32 -> (B, action_dim) f32.

    `prepared_params` must come from prepare_actor_params().
    Note: operands enter the MXU in bf16 (f32 accumulation), so expect ~1e-2
    level differences vs. a pure f32 reference.
    """
    w1, b1, w2, b2, w3, b3 = prepared_params
    B, S = state.shape
    s_pad = w1.shape[0]
    a_pad = w3.shape[1]

    n_steps, tb = _choose_batch_tiling(B, tile_b)
    b_pad = n_steps * tb

    # Per-call state prep: cast to bf16, pad batch + contraction dim with zeros.
    s_in = state.astype(jnp.bfloat16)
    if (b_pad, s_pad) != (B, S):
        s_in = jnp.zeros((b_pad, s_pad), jnp.bfloat16).at[:B, :S].set(s_in)

    resident = lambda shape: pl.BlockSpec(shape, lambda i: (0, 0))  # stays in VMEM

    kernel = functools.partial(_actor_kernel, max_action=float(max_action))
    out = pl.pallas_call(
        kernel,
        out_shape=jax.ShapeDtypeStruct((b_pad, a_pad), jnp.float32),
        grid=(n_steps,),
        in_specs=[
            pl.BlockSpec((tb, s_pad), lambda i: (i, 0)),   # state: streamed over batch
            resident(w1.shape), resident(b1.shape),
            resident(w2.shape), resident(b2.shape),
            resident(w3.shape), resident(b3.shape),
        ],
        # Output last dim equals the (narrow, 8-aligned) full-array last dim:
        # legal block shape, ~16x fewer HBM writeback bytes than 128-lane padding.
        out_specs=pl.BlockSpec((tb, a_pad), lambda i: (i, 0)),
        compiler_params=pltpu.CompilerParams(
            dimension_semantics=("parallel",)),
    )(s_in, w1, b1, w2, b2, w3, b3)

    return out[:B, :action_dim]


# --------------------------------------------------------------------------- #
# Init + reference
# --------------------------------------------------------------------------- #
def init_actor_params(key, state_dim, action_dim, hidden=HIDDEN):
    """Deterministic init mimicking PyTorch Linear default (uniform +/- 1/sqrt(fan_in)).

    Weights are stored already transposed: (in_features, out_features)."""
    ks = jax.random.split(key, 6)

    def linear(kw, kb, fan_in, fan_out):
        bound = 1.0 / jnp.sqrt(float(fan_in))
        w = jax.random.uniform(kw, (fan_in, fan_out), jnp.float32, -bound, bound)
        b = jax.random.uniform(kb, (1, fan_out), jnp.float32, -bound, bound)
        return w, b

    w1, b1 = linear(ks[0], ks[1], state_dim, hidden)
    w2, b2 = linear(ks[2], ks[3], hidden, hidden)
    w3, b3 = linear(ks[4], ks[5], hidden, action_dim)
    return (w1, b1, w2, b2, w3, b3)


def actor_reference(state, params, max_action):
    """Pure-JAX f32 reference matching the PyTorch module."""
    w1, b1, w2, b2, w3, b3 = params
    a = jax.nn.relu(state @ w1 + b1)
    a = jax.nn.relu(a @ w2 + b2)
    return max_action * jnp.tanh(a @ w3 + b3)


if __name__ == "__main__":
    state_dim, action_dim = 17, 6
    max_action = 1.0

    key = jax.random.PRNGKey(0)
    k_state, k_params, k_state2 = jax.random.split(key, 3)

    params = init_actor_params(k_params, state_dim, action_dim)
    prepared = prepare_actor_params(params)

    # Small batch (single-tile path).
    batch = 8
    state = jax.random.normal(k_state, (batch, state_dim), jnp.float32)
    out = actor_forward(state, prepared, max_action=max_action, action_dim=action_dim)
    out = jax.block_until_ready(out)
    ref = actor_reference(state, params, max_action)
    assert out.shape == (batch, action_dim)
    # bf16 MXU inputs (f32 accumulation) -> looser tolerance vs f32 reference.
    assert jnp.allclose(out, ref, atol=3e-2, rtol=3e-2), "mismatch vs reference (B=8)"

    # Slightly larger, non-aligned batch (multi-step grid + batch-padding path).
    batch2 = 40
    state2 = jax.random.normal(k_state2, (batch2, state_dim), jnp.float32)
    out2 = actor_forward(state2, prepared, max_action=max_action, action_dim=action_dim)
    out2 = jax.block_until_ready(out2)
    ref2 = actor_reference(state2, params, max_action)
    assert out2.shape == (batch2, action_dim)
    assert jnp.allclose(out2, ref2, atol=3e-2, rtol=3e-2), "mismatch vs reference (B=40)"

    print("KERNEL_OK")
</pallas_src>

<mosaic_0001>
module attributes {stable_mosaic.version = 11 : i64} {
  func.func @_actor_kernel(%arg0: i32, %arg1: memref<16x32xbf16, #tpu.memory_space<vmem>>, %arg2: memref<32x256xbf16, #tpu.memory_space<vmem>>, %arg3: memref<1x256xf32, #tpu.memory_space<vmem>>, %arg4: memref<256x256xbf16, #tpu.memory_space<vmem>>, %arg5: memref<1x256xf32, #tpu.memory_space<vmem>>, %arg6: memref<256x8xbf16, #tpu.memory_space<vmem>>, %arg7: memref<1x8xf32, #tpu.memory_space<vmem>>, %arg8: memref<16x8xf32, #tpu.memory_space<vmem>>) attributes {dimension_semantics = [#tpu.dimension_semantics<parallel>], iteration_bounds = array<i64: 1>, scalar_prefetch = 0 : i64, scratch_operands = 0 : i64, tpu.core_type = #tpu.core_type<tc>, window_params = [{transform_indices = @transform_0, window_bounds = array<i64: 16, 32>}, {pipeline_mode = #tpu.pipeline_mode<synchronous>, transform_indices = @transform_1, window_bounds = array<i64: 32, 256>}, {pipeline_mode = #tpu.pipeline_mode<synchronous>, transform_indices = @transform_2, window_bounds = array<i64: 1, 256>}, {pipeline_mode = #tpu.pipeline_mode<synchronous>, transform_indices = @transform_3, window_bounds = array<i64: 256, 256>}, {pipeline_mode = #tpu.pipeline_mode<synchronous>, transform_indices = @transform_4, window_bounds = array<i64: 1, 256>}, {pipeline_mode = #tpu.pipeline_mode<synchronous>, transform_indices = @transform_5, window_bounds = array<i64: 256, 8>}, {pipeline_mode = #tpu.pipeline_mode<synchronous>, transform_indices = @transform_6, window_bounds = array<i64: 1, 8>}, {transform_indices = @transform_7, window_bounds = array<i64: 16, 8>}]} {
    %c0 = arith.constant 0 : index
    %c0_0 = arith.constant 0 : index
    %0 = vector.load %arg1[%c0, %c0_0] : memref<16x32xbf16, #tpu.memory_space<vmem>>, vector<16x32xbf16>
    %c0_1 = arith.constant 0 : index
    %c0_2 = arith.constant 0 : index
    %1 = vector.load %arg2[%c0_1, %c0_2] : memref<32x256xbf16, #tpu.memory_space<vmem>>, vector<32x256xbf16>
    %cst = arith.constant dense<0.000000e+00> : vector<16x256xf32>
    %2 = tpu.matmul %0, %1, %cst {dimension_numbers = #tpu.dot_dimension_numbers<[1], [0], [0], [1], [0, 0, 1, 1], [], []>} : vector<16x32xbf16>, vector<32x256xbf16>, vector<16x256xf32> -> vector<16x256xf32>
    %c0_3 = arith.constant 0 : index
    %c0_4 = arith.constant 0 : index
    %3 = vector.load %arg3[%c0_3, %c0_4] : memref<1x256xf32, #tpu.memory_space<vmem>>, vector<1x256xf32>
    %4 = vector.broadcast %3 : vector<1x256xf32> to vector<16x256xf32>
    %5 = arith.addf %2, %4 : vector<16x256xf32>
    %cst_5 = arith.constant 0.000000e+00 : f32
    %6 = vector.broadcast %cst_5 : f32 to vector<16x256xf32>
    %7 = arith.maximumf %5, %6 : vector<16x256xf32>
    %8 = arith.truncf %7 : vector<16x256xf32> to vector<16x256xbf16>
    %c0_6 = arith.constant 0 : index
    %c0_7 = arith.constant 0 : index
    %9 = vector.load %arg4[%c0_6, %c0_7] : memref<256x256xbf16, #tpu.memory_space<vmem>>, vector<256x256xbf16>
    %cst_8 = arith.constant dense<0.000000e+00> : vector<16x256xf32>
    %10 = tpu.matmul %8, %9, %cst_8 {dimension_numbers = #tpu.dot_dimension_numbers<[1], [0], [0], [1], [0, 0, 1, 1], [], []>} : vector<16x256xbf16>, vector<256x256xbf16>, vector<16x256xf32> -> vector<16x256xf32>
    %c0_9 = arith.constant 0 : index
    %c0_10 = arith.constant 0 : index
    %11 = vector.load %arg5[%c0_9, %c0_10] : memref<1x256xf32, #tpu.memory_space<vmem>>, vector<1x256xf32>
    %12 = vector.broadcast %11 : vector<1x256xf32> to vector<16x256xf32>
    %13 = arith.addf %10, %12 : vector<16x256xf32>
    %cst_11 = arith.constant 0.000000e+00 : f32
    %14 = vector.broadcast %cst_11 : f32 to vector<16x256xf32>
    %15 = arith.maximumf %13, %14 : vector<16x256xf32>
    %16 = arith.truncf %15 : vector<16x256xf32> to vector<16x256xbf16>
    %c0_12 = arith.constant 0 : index
    %c0_13 = arith.constant 0 : index
    %17 = vector.load %arg6[%c0_12, %c0_13] : memref<256x8xbf16, #tpu.memory_space<vmem>>, vector<256x8xbf16>
    %cst_14 = arith.constant dense<0.000000e+00> : vector<16x8xf32>
    %18 = tpu.matmul %16, %17, %cst_14 {dimension_numbers = #tpu.dot_dimension_numbers<[1], [0], [0], [1], [0, 0, 1, 1], [], []>} : vector<16x256xbf16>, vector<256x8xbf16>, vector<16x8xf32> -> vector<16x8xf32>
    %c0_15 = arith.constant 0 : index
    %c0_16 = arith.constant 0 : index
    %19 = vector.load %arg7[%c0_15, %c0_16] : memref<1x8xf32, #tpu.memory_space<vmem>>, vector<1x8xf32>
    %20 = vector.broadcast %19 : vector<1x8xf32> to vector<16x8xf32>
    %21 = arith.addf %18, %20 : vector<16x8xf32>
    %22 = math.tanh %21 : vector<16x8xf32>
    %cst_17 = arith.constant 1.000000e+00 : f32
    %23 = vector.broadcast %cst_17 : f32 to vector<16x8xf32>
    %24 = arith.mulf %23, %22 : vector<16x8xf32>
    %c0_18 = arith.constant 0 : index
    %c0_19 = arith.constant 0 : index
    %25 = vector.load %arg8[%c0_18, %c0_19] : memref<16x8xf32, #tpu.memory_space<vmem>>, vector<16x8xf32>
    tpu.vector_store %arg8[%c0_18, %c0_19], %24 {strides = array<i32>} : memref<16x8xf32, #tpu.memory_space<vmem>>, vector<16x8xf32>,
    return
  }
  func.func @transform_0(%arg0: i32) -> (i32, i32) {
    %c0_i32 = arith.constant 0 : i32
    %c0_i32_0 = arith.constant 0 : i32
    return %arg0, %c0_i32 : i32, i32
  }
  func.func @transform_1(%arg0: i32) -> (i32, i32) {
    %c0_i32 = arith.constant 0 : i32
    %c0_i32_0 = arith.constant 0 : i32
    %c0_i32_1 = arith.constant 0 : i32
    return %c0_i32, %c0_i32_0 : i32, i32
  }
  func.func @transform_2(%arg0: i32) -> (i32, i32) {
    %c0_i32 = arith.constant 0 : i32
    %c0_i32_0 = arith.constant 0 : i32
    %c0_i32_1 = arith.constant 0 : i32
    return %c0_i32, %c0_i32_0 : i32, i32
  }
  func.func @transform_3(%arg0: i32) -> (i32, i32) {
    %c0_i32 = arith.constant 0 : i32
    %c0_i32_0 = arith.constant 0 : i32
    %c0_i32_1 = arith.constant 0 : i32
    return %c0_i32, %c0_i32_0 : i32, i32
  }
  func.func @transform_4(%arg0: i32) -> (i32, i32) {
    %c0_i32 = arith.constant 0 : i32
    %c0_i32_0 = arith.constant 0 : i32
    %c0_i32_1 = arith.constant 0 : i32
    return %c0_i32, %c0_i32_0 : i32, i32
  }
  func.func @transform_5(%arg0: i32) -> (i32, i32) {
    %c0_i32 = arith.constant 0 : i32
    %c0_i32_0 = arith.constant 0 : i32
    %c0_i32_1 = arith.constant 0 : i32
    return %c0_i32, %c0_i32_0 : i32, i32
  }
  func.func @transform_6(%arg0: i32) -> (i32, i32) {
    %c0_i32 = arith.constant 0 : i32
    %c0_i32_0 = arith.constant 0 : i32
    %c0_i32_1 = arith.constant 0 : i32
    return %c0_i32, %c0_i32_0 : i32, i32
  }
  func.func @transform_7(%arg0: i32) -> (i32, i32) {
    %c0_i32 = arith.constant 0 : i32
    %c0_i32_0 = arith.constant 0 : i32
    return %arg0, %c0_i32 : i32, i32
  }
}

</mosaic_0001>

<bundles_post_ra>
// kernel: actor_forward.1
= control target key start
LH: loop header
LB: loop body
LE: loop exit
PB: predicated region body
PF: predicated region fallthrough
CT: control target
= control target key end

     0   :  { %12 = vsyncpa [#allocation3], 0  ;;  %s756_s24 = smov [#allocation2]   ;;  %s890_s0 = inlined_call_operand.vmem [shape: bf16[16,32], index: 0, kind: input, shape index: {}]   ;;  %s891_s1 = inlined_call_operand.vmem [shape: bf16[32,256], index: 1, kind: input, shape index: {}]   ;;  %s892_s2 = inlined_call_operand.vmem [shape: f32[1,256], index: 2, kind: input, shape index: {}]   ;;  %s893_s3 = inlined_call_operand.hbm [shape: bf16[256,256], index: 3, kind: input, shape index: {}]   ;;  %s894_s4 = inlined_call_operand.vmem [shape: f32[1,256], index: 4, kind: input, shape index: {}]   ;;  %s895_s5 = inlined_call_operand.vmem [shape: bf16[256,8], index: 5, kind: input, shape index: {}]   ;;  %s896_s6 = inlined_call_operand.vmem [shape: f32[1,8], index: 6, kind: input, shape index: {}]   ;;  %s897_s7 = inlined_call_operand.vmem [shape: f32[16,8], index: 7, kind: output, shape index: {}]  }
   0x1   :  { %s24_s25 = sshll.u32 %s756_s24, 4  ;;  %s732_s28 = scalar_lea.hbm %s893_s3, 4096  ;;  %s25_s25 = int_to_ptr.vmem [resolvable:$true] %s24_s25 }
   0x2   :  { %p733_p0 = scmp.ne.s32.totalorder %s893_s3, %s732_s28  ;;  %p736_p1 = scmp.lt.u32.totalorder %s732_s28, %s893_s3 }
   0x4   :  { %p738_p2 = pnand %p736_p1, %p733_p0 }
   0x6   :  { %741 = shalt.err (!%p738_p2)
}
   0x7   :  { %s742_s10 = scalar_lea.vmem %s25_s25, 4096  ;;  %p747_p4 = scmp.lt.s32.totalorder %s25_s25, %s25_s25 }
   0x8   :  { %p743_p3 = scmp.ne.s32.totalorder %s25_s25, %s742_s10  ;;  %p748_p5 = scmp.lt.s32.totalorder %s742_s10, %s742_s10 }
   0xa   :  { %p749_p6 = por %p748_p5, %p747_p4 }
   0xc   :  { %p750_p7 = pnand %p749_p6, %p743_p3 }
   0xe   :  { %753 = shalt.err (!%p750_p7)
}
   0xf   :  { %s757_s11 = smov 128   ;;  %s758_s12 = smov 8  }
  0x10   :  { %30 = dma.hbm_to_vmem [thread:$0]  %s893_s3, 4096, %s25_s25, [#allocation3], %s757_s11, %s757_s11, %s758_s12  }
  0x11   :  { %754 = dma.done.wait [#allocation3], 4096  }
  0x12   :  { %755 = vsyncadd [#allocation3], 4294963200  ;;  %v759_v0 = vmov 0   ;;  %v657_v1 = vld [vmem:[%s891_s1 + $0x4] ss:$8 sps:$4 sm:$0xff]   ;;  %vm84_vm0 = vcmask 261120   ;;  %v49_v49 = vlaneseq }
  0x13   :  { %120 = vmatprep.mubr.bf16.mxu0 %v759_v0  ;;  %v659_v2 = vld [vmem:[%s891_s1] ss:$8 sps:$4 sm:$0xff]   ;;  %88 = vmatprep.subr.bf16.mxu0 %v657_v1  ;;  %v660_v3 = vld [vmem:[%s891_s1 + $0x14] ss:$8 sps:$4 sm:$0xff]   ;;  %v662_v4 = vld [vmem:[%s891_s1 + $0x10] ss:$8 sps:$4 sm:$0xff]  }
  0x14   :  { %89 = vmatpush1.bf16.msra.mxu0 %v659_v2  ;;  %v664_v5 = vld [vmem:[#allocation2 + $0x4] ss:$8 sps:$4 sm:$0xff]   ;;  %v666_v6 = vld [vmem:[#allocation2] ss:$8 sps:$4 sm:$0xff]   ;;  %v667_v7 = vld [vmem:[#allocation2 + $0x14] ss:$8 sps:$4 sm:$0xff]  }
  0x15   :  { %90 = vmatprep.subr.bf16.mxu0 %v660_v3  ;;  %v663_v8 = vld [vmem:[%s890_s0] sm:$0xff]   ;;  %341 = vmatprep.subr.bf16.mxu1 %v664_v5  ;;  %v669_v9 = vld [vmem:[#allocation2 + $0x10] ss:$8 sps:$4 sm:$0xff]   ;;  %v673_v12 = vld [vmem:[#allocation2 + $0x34] ss:$8 sps:$4 sm:$0xff]   ;;  %v50_v50 = vshrl.u32 %v49_v49, 7 }
  0x16   :  { %342 = vmatpush1.bf16.msra.mxu1 %v666_v6  ;;  %v670_v10 = vld [vmem:[#allocation2 + $0x24] ss:$8 sps:$4 sm:$0xff]   ;;  %v672_v11 = vld [vmem:[#allocation2 + $0x20] ss:$8 sps:$4 sm:$0xff]   ;;  %v675_v13 = vld [vmem:[#allocation2 + $0x30] ss:$8 sps:$4 sm:$0xff]  }
  0x17   :  { %343 = vmatprep.subr.bf16.mxu1 %v667_v7  ;;  %v676_v14 = vld [vmem:[#allocation2 + $0x44] ss:$8 sps:$4 sm:$0xff]   ;;  %v678_v15 = vld [vmem:[#allocation2 + $0x40] ss:$8 sps:$4 sm:$0xff]   ;;  %v679_v16 = vld [vmem:[#allocation2 + $0x54] ss:$8 sps:$4 sm:$0xff]  }
  0x18   :  { %91 = vmatpush1.bf16.msra.mxu0 %v662_v4  ;;  %v681_v17 = vld [vmem:[#allocation2 + $0x50] ss:$8 sps:$4 sm:$0xff]   ;;  %v682_v18 = vld [vmem:[#allocation2 + $0x64] ss:$8 sps:$4 sm:$0xff]   ;;  %v684_v19 = vld [vmem:[#allocation2 + $0x60] ss:$8 sps:$4 sm:$0xff]  }
  0x19   :  { %v685_v20 = vld [vmem:[#allocation2 + $0x74] ss:$8 sps:$4 sm:$0xff]   ;;  %v687_v21 = vld [vmem:[#allocation2 + $0x70] ss:$8 sps:$4 sm:$0xff]   ;;  %v688_v22 = vld [vmem:[#allocation2 + $0x84] ss:$8 sps:$4 sm:$0xff]  }
  0x1a   :  { %344 = vmatpush1.bf16.msra.mxu1 %v669_v9  ;;  %v690_v23 = vld [vmem:[#allocation2 + $0x80] ss:$8 sps:$4 sm:$0xff]   ;;  %v691_v24 = vld [vmem:[#allocation2 + $0x94] ss:$8 sps:$4 sm:$0xff]   ;;  %v693_v25 = vld [vmem:[#allocation2 + $0x90] ss:$8 sps:$4 sm:$0xff]  }
  0x1b   :  { %581 = vmatmul.mubr.msk.bf16.vlgmr.msra.gmra.mrb[0].mxu0 %vm84_vm0, %v663_v8  ;;  %345 = vmatprep.subr.bf16.mxu1 %v670_v10  ;;  %v694_v26 = vld [vmem:[#allocation2 + $0xa4] ss:$8 sps:$4 sm:$0xff]   ;;  %v696_v27 = vld [vmem:[#allocation2 + $0xa0] ss:$8 sps:$4 sm:$0xff]   ;;  %v697_v28 = vld [vmem:[#allocation2 + $0xb4] ss:$8 sps:$4 sm:$0xff]  }
  0x1c   :  { %v699_v29 = vld [vmem:[#allocation2 + $0xb0] ss:$8 sps:$4 sm:$0xff]   ;;  %v700_v30 = vld [vmem:[#allocation2 + $0xc4] ss:$8 sps:$4 sm:$0xff]   ;;  %v702_v31 = vld [vmem:[#allocation2 + $0xc0] ss:$8 sps:$4 sm:$0xff]  }
  0x1d   :  { %v703_v32 = vld [vmem:[#allocation2 + $0xd4] ss:$8 sps:$4 sm:$0xff]   ;;  %v705_v33 = vld [vmem:[#allocation2 + $0xd0] ss:$8 sps:$4 sm:$0xff]   ;;  %v706_v34 = vld [vmem:[#allocation2 + $0xe4] ss:$8 sps:$4 sm:$0xff]  }
  0x1e   :  { %346 = vmatpush1.bf16.msra.mxu1 %v672_v11  ;;  %v708_v35 = vld [vmem:[#allocation2 + $0xe0] ss:$8 sps:$4 sm:$0xff]   ;;  %v709_v36 = vld [vmem:[#allocation2 + $0xf4] ss:$8 sps:$4 sm:$0xff]   ;;  %v711_v37 = vld [vmem:[#allocation2 + $0xf0] ss:$8 sps:$4 sm:$0xff]  }
  0x1f   :  { %347 = vmatprep.subr.bf16.mxu1 %v673_v12  ;;  %v712_v38 = vld [vmem:[%s895_s5 + $0x40] sm:$0xff]   ;;  %v714_v40 = vld [vmem:[%s895_s5 + $0x48] sm:$0xff]   ;;  %v716_v42 = vld [vmem:[%s895_s5 + $0x50] sm:$0xff]   ;;  %v51_v51 = vsub.s32 0, %v50_v50  ;;  %v55_v53 = vsub.s32 1, %v50_v50  ;;  %vm568_vm1 = vcmask 64512  }
  0x20   :  { %v713_v39 = vld [vmem:[%s895_s5] sm:$0xff]   ;;  %631 = vmatprep.subr.bf16.mxu0 %v712_v38  ;;  %v715_v41 = vld [vmem:[%s895_s5 + $0x8] sm:$0xff]   ;;  %v717_v43 = vld [vmem:[%s895_s5 + $0x10] sm:$0xff]  }
  0x21   :  { %632 = vmatpush3.bf16.msra.mxu0 %v713_v39  ;;  %v718_v44 = vld [vmem:[%s895_s5 + $0x58] sm:$0xff]   ;;  %v720_v46 = vld [vmem:[%s895_s5 + $0x60] sm:$0xff]   ;;  %v722_v48 = vld [vmem:[%s895_s5 + $0x68] sm:$0xff]  }
  0x22   :  { %348 = vmatpush1.bf16.msra.mxu1 %v675_v13  ;;  %633 = vmatprep.subr.bf16.mxu0 %v714_v40  ;;  %v719_v45 = vld [vmem:[%s895_s5 + $0x18] sm:$0xff]   ;;  %v721_v47 = vld [vmem:[%s895_s5 + $0x20] sm:$0xff]   ;;  %v723_v6 = vld [vmem:[%s895_s5 + $0x28] sm:$0xff]  }
  0x23   :  { %349 = vmatprep.subr.bf16.mxu1 %v676_v14  ;;  %v47_v52 = vld [vmem:[%s892_s2] sm:$0x3]  ;;  %v724_v7 = vld [vmem:[%s895_s5 + $0x70] sm:$0xff]   ;;  %v726_v9 = vld [vmem:[%s895_s5 + $0x78] sm:$0xff]  }
  0x24   :  { %v52_v54 = vrot.slane %v47_v52, %v51_v51  ;;  %v56_v55 = vrot.slane %v47_v52, %v55_v53  ;;  %v725_v8 = vld [vmem:[%s895_s5 + $0x30] sm:$0xff]   ;;  %v727_v10 = vld [vmem:[%s895_s5 + $0x38] sm:$0xff]   ;;  %v169_v11 = vld [vmem:[%s894_s4] sm:$0x3] }
  0x25   :  { %634 = vmatpush3.bf16.msra.mxu0 %v715_v41  ;;  %v174_v12 = vrot.slane %v169_v11, %v51_v51  ;;  %v178_v13 = vrot.slane %v169_v11, %v55_v53 }
  0x26   :  { %350 = vmatpush1.bf16.msra.mxu1 %v678_v15  ;;  %635 = vmatprep.subr.bf16.mxu0 %v716_v42 }
  0x27   :  { %351 = vmatprep.subr.bf16.mxu1 %v679_v16 }
  0x29   :  { %636 = vmatpush3.bf16.msra.mxu0 %v717_v43 }
  0x2a   :  { %352 = vmatpush1.bf16.msra.mxu1 %v681_v17  ;;  %637 = vmatprep.subr.bf16.mxu0 %v718_v44 }
  0x2b   :  { %353 = vmatprep.subr.bf16.mxu1 %v682_v18 }
  0x2d   :  { %638 = vmatpush3.bf16.msra.mxu0 %v719_v45 }
  0x2e   :  { %354 = vmatpush1.bf16.msra.mxu1 %v684_v19  ;;  %639 = vmatprep.subr.bf16.mxu0 %v720_v46 }
  0x2f   :  { %355 = vmatprep.subr.bf16.mxu1 %v685_v20 }
  0x31   :  { %640 = vmatpush3.bf16.msra.mxu0 %v721_v47 }
  0x32   :  { %356 = vmatpush1.bf16.msra.mxu1 %v687_v21  ;;  %641 = vmatprep.subr.bf16.mxu0 %v722_v48 }
  0x33   :  { %357 = vmatprep.subr.bf16.mxu1 %v688_v22 }
  0x35   :  { %642 = vmatpush3.bf16.msra.mxu0 %v723_v6 }
  0x36   :  { %358 = vmatpush1.bf16.msra.mxu1 %v690_v23  ;;  %643 = vmatprep.subr.bf16.mxu0 %v724_v7 }
  0x37   :  { %359 = vmatprep.subr.bf16.mxu1 %v691_v24 }
  0x39   :  { %644 = vmatpush3.bf16.msra.mxu0 %v725_v8 }
  0x3a   :  { %360 = vmatpush1.bf16.msra.mxu1 %v693_v25  ;;  %645 = vmatprep.subr.bf16.mxu0 %v726_v9 }
  0x3b   :  { %361 = vmatprep.subr.bf16.mxu1 %v694_v26 }
  0x3d   :  { %646 = vmatpush3.bf16.msra.mxu0 %v727_v10 }
  0x3e   :  { %362 = vmatpush1.bf16.msra.mxu1 %v696_v27 }
  0x3f   :  { %363 = vmatprep.subr.bf16.mxu1 %v697_v28 }
  0x42   :  { %364 = vmatpush1.bf16.msra.mxu1 %v699_v29  ;;  %v614_v29 = vld [vmem:[%s896_s6] ss:$0 sm:$0xff] }
  0x43   :  { %365 = vmatprep.subr.bf16.mxu1 %v700_v30 }
  0x46   :  { %366 = vmatpush1.bf16.msra.mxu1 %v702_v31 }
  0x47   :  { %367 = vmatprep.subr.bf16.mxu1 %v703_v32 }
  0x4a   :  { %368 = vmatpush1.bf16.msra.mxu1 %v705_v33 }
  0x4b   :  { %369 = vmatprep.subr.bf16.mxu1 %v706_v34 }
  0x4e   :  { %370 = vmatpush1.bf16.msra.mxu1 %v708_v35 }
  0x4f   :  { %371 = vmatprep.subr.bf16.mxu1 %v709_v36 }
  0x52   :  { %372 = vmatpush1.bf16.msra.mxu1 %v711_v37 }
  0xee   :  { %v122_v56 = vpop.f32.mrb[0].mxu0 }
  0xef   :  { %v123_v57 = vadd.f32 %v122_v56, %v52_v54  ;;  %v124_v58 = vpop.f32.mrb[1].mxu0 }
  0xf0   :  { %v125_v59 = vadd.f32 %v124_v58, %v56_v55  ;;  %v126_v60 = vpop.f32.mrb[2].mxu0 }
  0xf1   :  { %v127_v61 = vadd.f32 %v126_v60, %v52_v54  ;;  %v128_v62 = vpop.f32.mrb[3].mxu0  ;;  %v131_v0 = vmax.f32 %v123_v57, 0.0 }
  0xf2   :  { %v129_v63 = vadd.f32 %v128_v62, %v56_v55  ;;  %v132_v2 = vmax.f32 %v125_v59, 0.0 }
  0xf3   :  { %v133_v1 = vmax.f32 %v127_v61, 0.0 }
  0xf4   :  { %v134_v3 = vmax.f32 %v129_v63, 0.0 }
  0xf5   :  { %v135_v4 = vpack.c.bf16 %v133_v1, %v131_v0 }
  0xf6   :  { %v136_v5 = vpack.c.bf16 %v134_v3, %v132_v2 }
  0xf8   :  { %373 = vmatprep.mubr.bf16.mxu1 %v136_v5 }
  0xf9   :  { %374 = vmatmul.mubr.bf16.vlgmr.msra.gmra.mrb[0].mxu1 %v135_v4 }
 0x1cc   :  { %v375_v14 = vpop.f32.mrb[0].mxu1 }
 0x1cd   :  { %v376_v15 = vadd.f32 %v375_v14, %v174_v12  ;;  %v377_v16 = vpop.f32.mrb[1].mxu1 }
 0x1ce   :  { %v378_v17 = vadd.f32 %v377_v16, %v178_v13  ;;  %v379_v18 = vpop.f32.mrb[2].mxu1 }
 0x1cf   :  { %v380_v19 = vadd.f32 %v379_v18, %v174_v12  ;;  %v381_v20 = vpop.f32.mrb[3].mxu1  ;;  %v384_v22 = vmax.f32 %v376_v15, 0.0 }
 0x1d0   :  { %v382_v21 = vadd.f32 %v381_v20, %v178_v13  ;;  %v385_v24 = vmax.f32 %v378_v17, 0.0 }
 0x1d1   :  { %v386_v23 = vmax.f32 %v380_v19, 0.0 }
 0x1d2   :  { %v387_v25 = vmax.f32 %v382_v21, 0.0 }
 0x1d3   :  { %v388_v26 = vpack.c.bf16 %v386_v23, %v384_v22 }
 0x1d4   :  { %v389_v27 = vpack.c.bf16 %v387_v25, %v385_v24 }
 0x1d6   :  { %557 = vmatprep.mubr.bf16.mxu0 %v389_v27 }
 0x1d7   :  { %558 = vmatmul.mubr.bf16.vlgmr.msra.gmra.mrb[4].mxu0 %v388_v26 }
 0x2aa   :  { %v647_v28 = vpop.f32.mrb[4].mxu0 }
 0x2ab   :  { %v648_v30 = vpop.f32.mrb[5].mxu0 }
 0x2ac   :  { %v649_v31 = vadd.f32 %v648_v30, %v647_v28  ;;  %v650_v32 = vpop.f32.mrb[6].mxu0 }
 0x2ad   :  { %v651_v33 = vpop.f32.mrb[7].mxu0 }
 0x2ae   :  { %v560_v34 = vadd.f32 %v649_v31, %v614_v29  ;;  %v652_v35 = vadd.f32 %v651_v33, %v650_v32 }
 0x2b0   :  { %728 = vtanh.f32 %v560_v34  ;;  %v563_v36 = vadd.f32 %v652_v35, %v614_v29 }
 0x2b2   :  { %730 = vtanh.f32 %v563_v36 }
 0x2ba   :  { %v729_v37 = vpop.eup %728 }
 0x2bb   :  { %569 = vst.msk [vmem:[%s897_s7] sm:$0xff] %vm568_vm1, %v729_v37 }
 0x2bc   :  { %v731_v38 = vpop.eup %730 }
 0x2bd   :  { %570 = vst.msk [vmem:[%s897_s7 + $0x8] sm:$0xff] %vm568_vm1, %v731_v38 }
 0x2be   :  { %575 = vsyncpa [#allocation3], 1 }

</bundles_post_ra>
